<compile_context>
chip_gen: v6e
topology: v6e:2x2x1
jax: 0.10.0
libtpu: 0.0.40
codegen_flags: <defaults>
</compile_context>

<pallas_src>
import jax
import jax.numpy as jnp
from jax import lax
from jax.experimental import pallas as pl
from jax.experimental.pallas import tpu as pltpu


def _round_up(v: int, m: int) -> int:
    return ((v + m - 1) // m) * m


def critic_kernel(x_ref, w1_ref, b1_ref, w2_ref, b2_ref, w3_ref, b3_ref, o_ref):
    # x tile is in its natural [TB, num_obs] layout; the first matmul contracts
    # the last dim of both operands so the transpose is absorbed by the MXU/XLU.
    x_bf = x_ref[...].astype(jnp.bfloat16)                        # [TB, num_obs]

    # layer 1: [h1, num_obs] contracted with [TB, num_obs] -> [h1, TB]
    h = lax.dot_general(
        w1_ref[...], x_bf,
        dimension_numbers=(((1,), (1,)), ((), ())),
        preferred_element_type=jnp.float32)
    h = jnp.maximum(h + b1_ref[...], 0.0)                         # [h1, TB] f32

    # layer 2: [h2, h1] x [h1, TB] -> [h2, TB]
    h = jnp.dot(w2_ref[...], h.astype(jnp.bfloat16),
                preferred_element_type=jnp.float32)
    h = jnp.maximum(h + b2_ref[...], 0.0)                         # [h2, TB] f32

    # value head (h2 -> 1): elementwise multiply + sublane reduce (VPU/XLU),
    # avoids a 1-column MXU matmul that would be almost pure drain latency.
    v = jnp.sum(w3_ref[...] * h, axis=0, keepdims=True) + b3_ref[...]  # [1, TB]
    o_ref[...] = v.astype(o_ref.dtype)


def prepare_params(params):
    """One-time parameter prep (bf16 MXU weights, f32 bias columns).

    `params` is in native PyTorch layout: W [out, in], b [out].
    Call this once and reuse the result for every forward call.
    """
    (w1, b1), (w2, b2), (w3, b3) = params
    return (
        w1.astype(jnp.bfloat16),                   # [h1, num_obs]
        b1.reshape(-1, 1).astype(jnp.float32),     # [h1, 1]
        w2.astype(jnp.bfloat16),                   # [h2, h1]
        b2.reshape(-1, 1).astype(jnp.float32),     # [h2, 1]
        w3.reshape(-1, 1).astype(jnp.float32),     # [h2, 1]  (value-head column)
        b3.reshape(1, 1).astype(jnp.float32),      # [1, 1]
    )


def critic_forward(x, prepared_params, *, tb_max=16384):
    """x: [B, num_observation] f32 -> value estimate [B, 1] f32."""
    w1_bf, b1_c, w2_bf, b2_c, w3_c, b3_c = prepared_params
    B, num_obs = x.shape
    h1 = w1_bf.shape[0]
    h2 = w2_bf.shape[0]

    # Robustness: batch tile must be a multiple of 128 lanes, floor at 128.
    tb_max = max(128, (int(tb_max) // 128) * 128)

    # Minimal padding: batch only up to the next multiple of 128.
    B_pad128 = _round_up(B, 128)

    # Number of batch tiles; on multi-TC chips (v7x) prefer >=2 and even grids
    # so both TensorCores get work, without shrinking TB below 128.
    num_tiles = pl.cdiv(B_pad128, tb_max)
    if num_tiles == 1 and B_pad128 >= 256:
        num_tiles = 2
    elif num_tiles > 1 and num_tiles % 2 == 1:
        num_tiles += 1
    TB = _round_up(pl.cdiv(B_pad128, num_tiles), 128)
    grid_n = pl.cdiv(B_pad128, TB)
    B_pad = grid_n * TB

    # No transpose pass; pad rows only if the batch is not already tile-aligned.
    x_in = x if B_pad == B else jnp.pad(x, ((0, B_pad - B), (0, 0)))

    flops = 2 * B_pad * (num_obs * h1 + h1 * h2 + h2)
    bytes_accessed = (
        4 * num_obs * B_pad              # x (f32)
        + 4 * B_pad                      # out (f32)
        + 2 * (h1 * num_obs + h2 * h1)   # bf16 weights
        + 4 * (h1 + h2 + h2 + 1)         # f32 biases + value head
    )

    out = pl.pallas_call(
        critic_kernel,
        out_shape=jax.ShapeDtypeStruct((1, B_pad), jnp.float32),
        grid=(grid_n,),
        in_specs=[
            pl.BlockSpec((TB, num_obs), lambda i: (i, 0)),   # x tile (pipelined)
            pl.BlockSpec((h1, num_obs), lambda i: (0, 0)),   # weights stay resident
            pl.BlockSpec((h1, 1), lambda i: (0, 0)),
            pl.BlockSpec((h2, h1), lambda i: (0, 0)),
            pl.BlockSpec((h2, 1), lambda i: (0, 0)),
            pl.BlockSpec((h2, 1), lambda i: (0, 0)),
            pl.BlockSpec((1, 1), lambda i: (0, 0)),
        ],
        out_specs=pl.BlockSpec((1, TB), lambda i: (0, i)),   # lane-dense output
        compiler_params=pltpu.CompilerParams(
            dimension_semantics=("parallel",),               # v7x: 2 TCs share batch
            vmem_limit_bytes=32 * 1024 * 1024,               # fits all gens
        ),
        cost_estimate=pl.CostEstimate(
            flops=flops, transcendentals=0, bytes_accessed=bytes_accessed
        ),
    )(x_in, w1_bf, b1_c, w2_bf, b2_c, w3_c, b3_c)

    # Row-slice + reshape (free) instead of a layout-changing transpose.
    return out[0, :B].reshape(B, 1)


def init_params(key, num_observation, hidden_dims):
    """Deterministic small init in native PyTorch layout: W [out, in], b [out]."""
    if isinstance(hidden_dims, int):
        hidden_dims = [hidden_dims]
    dims = [num_observation] + list(hidden_dims) + [1]
    params = []
    for i in range(len(dims) - 1):
        in_dim, out_dim = dims[i], dims[i + 1]
        key, wk = jax.random.split(key)
        w = jax.random.normal(wk, (out_dim, in_dim), jnp.float32) * 0.1
        b = jnp.zeros((out_dim,), jnp.float32)
        params.append((w, b))
    return params


def critic_ref_f32(x, params):
    """Pure-f32 JAX reference of the module's forward pass."""
    (w1, b1), (w2, b2), (w3, b3) = params
    h = jnp.maximum(x @ w1.T + b1[None, :], 0.0)
    h = jnp.maximum(h @ w2.T + b2[None, :], 0.0)
    return h @ w3.T + b3[None, :]


def critic_ref_mxu(x, params):
    """Reference replicating the kernel's numeric recipe (bf16 MXU, f32 accum)."""
    (w1, b1), (w2, b2), (w3, b3) = params
    h = jnp.dot(x.astype(jnp.bfloat16), w1.astype(jnp.bfloat16).T,
                preferred_element_type=jnp.float32)
    h = jnp.maximum(h + b1[None, :], 0.0)
    h = jnp.dot(h.astype(jnp.bfloat16), w2.astype(jnp.bfloat16).T,
                preferred_element_type=jnp.float32)
    h = jnp.maximum(h + b2[None, :], 0.0)
    v = jnp.sum(h * w3.reshape(1, -1), axis=-1, keepdims=True) + b3.reshape(1, 1)
    return v


if __name__ == "__main__":
    num_observation = 16
    hidden_dims = [32, 32]

    key = jax.random.PRNGKey(0)
    params = init_params(key, num_observation, hidden_dims)
    prepared = prepare_params(params)   # hoisted out of the forward path

    # batch=8 exercises the single-tile path; batch=384 exercises the
    # multi-tile (even grid, minimal-padding) path.
    for batch in (8, 384):
        key, xk = jax.random.split(key)
        x = jax.random.normal(xk, (batch, num_observation), jnp.float32)

        out = jax.block_until_ready(critic_forward(x, prepared))
        assert out.shape == (batch, 1)

        # Strict check vs a reference using the same bf16-MXU / f32-accumulate recipe.
        ref_mxu = critic_ref_mxu(x, params)
        assert jnp.allclose(out, ref_mxu, atol=1e-3, rtol=1e-3), (batch, out, ref_mxu)

        # Loose check vs the pure-f32 forward (bf16 weight quantization tolerance).
        ref_f32 = critic_ref_f32(x, params)
        assert jnp.allclose(out, ref_f32, atol=5e-2, rtol=5e-2), (batch, out, ref_f32)

    print("KERNEL_OK")
</pallas_src>

<mosaic_0001>
module attributes {stable_mosaic.version = 11 : i64} {
  func.func @critic_kernel(%arg0: i32, %arg1: memref<128x16xf32, #tpu.memory_space<vmem>>, %arg2: memref<32x16xbf16, #tpu.memory_space<vmem>>, %arg3: memref<32x1xf32, #tpu.memory_space<vmem>>, %arg4: memref<32x32xbf16, #tpu.memory_space<vmem>>, %arg5: memref<32x1xf32, #tpu.memory_space<vmem>>, %arg6: memref<32x1xf32, #tpu.memory_space<vmem>>, %arg7: memref<1x1xf32, #tpu.memory_space<vmem>>, %arg8: memref<1x128xf32, #tpu.memory_space<vmem>>) attributes {dimension_semantics = [#tpu.dimension_semantics<parallel>], iteration_bounds = array<i64: 1>, scalar_prefetch = 0 : i64, scratch_operands = 0 : i64, tpu.core_type = #tpu.core_type<tc>, window_params = [{transform_indices = @transform_0, window_bounds = array<i64: 128, 16>}, {pipeline_mode = #tpu.pipeline_mode<synchronous>, transform_indices = @transform_1, window_bounds = array<i64: 32, 16>}, {pipeline_mode = #tpu.pipeline_mode<synchronous>, transform_indices = @transform_2, window_bounds = array<i64: 32, 1>}, {pipeline_mode = #tpu.pipeline_mode<synchronous>, transform_indices = @transform_3, window_bounds = array<i64: 32, 32>}, {pipeline_mode = #tpu.pipeline_mode<synchronous>, transform_indices = @transform_4, window_bounds = array<i64: 32, 1>}, {pipeline_mode = #tpu.pipeline_mode<synchronous>, transform_indices = @transform_5, window_bounds = array<i64: 32, 1>}, {pipeline_mode = #tpu.pipeline_mode<synchronous>, transform_indices = @transform_6, window_bounds = array<i64: 1, 1>}, {transform_indices = @transform_7, window_bounds = array<i64: 1, 128>}]} {
    %c0 = arith.constant 0 : index
    %c0_0 = arith.constant 0 : index
    %0 = vector.load %arg1[%c0, %c0_0] : memref<128x16xf32, #tpu.memory_space<vmem>>, vector<128x16xf32>
    %1 = arith.truncf %0 : vector<128x16xf32> to vector<128x16xbf16>
    %c0_1 = arith.constant 0 : index
    %c0_2 = arith.constant 0 : index
    %2 = vector.load %arg2[%c0_1, %c0_2] : memref<32x16xbf16, #tpu.memory_space<vmem>>, vector<32x16xbf16>
    %cst = arith.constant dense<0.000000e+00> : vector<32x128xf32>
    %3 = tpu.matmul %2, %1, %cst {dimension_numbers = #tpu.dot_dimension_numbers<[1], [1], [0], [0], [0, 0, 1, 0], [], []>} : vector<32x16xbf16>, vector<128x16xbf16>, vector<32x128xf32> -> vector<32x128xf32>
    %c0_3 = arith.constant 0 : index
    %c0_4 = arith.constant 0 : index
    %4 = vector.load %arg3[%c0_3, %c0_4] : memref<32x1xf32, #tpu.memory_space<vmem>>, vector<32x1xf32>
    %5 = vector.broadcast %4 : vector<32x1xf32> to vector<32x128xf32>
    %6 = arith.addf %3, %5 : vector<32x128xf32>
    %cst_5 = arith.constant 0.000000e+00 : f32
    %7 = vector.broadcast %cst_5 : f32 to vector<32x128xf32>
    %8 = arith.maximumf %6, %7 : vector<32x128xf32>
    %c0_6 = arith.constant 0 : index
    %c0_7 = arith.constant 0 : index
    %9 = vector.load %arg4[%c0_6, %c0_7] : memref<32x32xbf16, #tpu.memory_space<vmem>>, vector<32x32xbf16>
    %10 = arith.truncf %8 : vector<32x128xf32> to vector<32x128xbf16>
    %cst_8 = arith.constant dense<0.000000e+00> : vector<32x128xf32>
    %11 = tpu.matmul %9, %10, %cst_8 {dimension_numbers = #tpu.dot_dimension_numbers<[1], [0], [0], [1], [0, 0, 1, 1], [], []>} : vector<32x32xbf16>, vector<32x128xbf16>, vector<32x128xf32> -> vector<32x128xf32>
    %c0_9 = arith.constant 0 : index
    %c0_10 = arith.constant 0 : index
    %12 = vector.load %arg5[%c0_9, %c0_10] : memref<32x1xf32, #tpu.memory_space<vmem>>, vector<32x1xf32>
    %13 = vector.broadcast %12 : vector<32x1xf32> to vector<32x128xf32>
    %14 = arith.addf %11, %13 : vector<32x128xf32>
    %cst_11 = arith.constant 0.000000e+00 : f32
    %15 = vector.broadcast %cst_11 : f32 to vector<32x128xf32>
    %16 = arith.maximumf %14, %15 : vector<32x128xf32>
    %c0_12 = arith.constant 0 : index
    %c0_13 = arith.constant 0 : index
    %17 = vector.load %arg6[%c0_12, %c0_13] : memref<32x1xf32, #tpu.memory_space<vmem>>, vector<32x1xf32>
    %18 = vector.broadcast %17 : vector<32x1xf32> to vector<32x128xf32>
    %19 = arith.mulf %18, %16 : vector<32x128xf32>
    %cst_14 = arith.constant dense<0.000000e+00> : vector<128xf32>
    %20 = vector.multi_reduction <add>, %19, %cst_14 [0] : vector<32x128xf32> to vector<128xf32>
    %21 = vector.shape_cast %20 : vector<128xf32> to vector<1x128xf32>
    %c0_15 = arith.constant 0 : index
    %c0_16 = arith.constant 0 : index
    %22 = vector.load %arg7[%c0_15, %c0_16] : memref<1x1xf32, #tpu.memory_space<vmem>>, vector<1x1xf32>
    %23 = vector.broadcast %22 : vector<1x1xf32> to vector<1x128xf32>
    %24 = arith.addf %21, %23 : vector<1x128xf32>
    %c0_17 = arith.constant 0 : index
    %c0_18 = arith.constant 0 : index
    %25 = vector.load %arg8[%c0_17, %c0_18] : memref<1x128xf32, #tpu.memory_space<vmem>>, vector<1x128xf32>
    tpu.vector_store %arg8[%c0_17, %c0_18], %24 {strides = array<i32>} : memref<1x128xf32, #tpu.memory_space<vmem>>, vector<1x128xf32>,
    return
  }
  func.func @transform_0(%arg0: i32) -> (i32, i32) {
    %c0_i32 = arith.constant 0 : i32
    %c0_i32_0 = arith.constant 0 : i32
    return %arg0, %c0_i32 : i32, i32
  }
  func.func @transform_1(%arg0: i32) -> (i32, i32) {
    %c0_i32 = arith.constant 0 : i32
    %c0_i32_0 = arith.constant 0 : i32
    %c0_i32_1 = arith.constant 0 : i32
    return %c0_i32, %c0_i32_0 : i32, i32
  }
  func.func @transform_2(%arg0: i32) -> (i32, i32) {
    %c0_i32 = arith.constant 0 : i32
    %c0_i32_0 = arith.constant 0 : i32
    %c0_i32_1 = arith.constant 0 : i32
    return %c0_i32, %c0_i32_0 : i32, i32
  }
  func.func @transform_3(%arg0: i32) -> (i32, i32) {
    %c0_i32 = arith.constant 0 : i32
    %c0_i32_0 = arith.constant 0 : i32
    %c0_i32_1 = arith.constant 0 : i32
    return %c0_i32, %c0_i32_0 : i32, i32
  }
  func.func @transform_4(%arg0: i32) -> (i32, i32) {
    %c0_i32 = arith.constant 0 : i32
    %c0_i32_0 = arith.constant 0 : i32
    %c0_i32_1 = arith.constant 0 : i32
    return %c0_i32, %c0_i32_0 : i32, i32
  }
  func.func @transform_5(%arg0: i32) -> (i32, i32) {
    %c0_i32 = arith.constant 0 : i32
    %c0_i32_0 = arith.constant 0 : i32
    %c0_i32_1 = arith.constant 0 : i32
    return %c0_i32, %c0_i32_0 : i32, i32
  }
  func.func @transform_6(%arg0: i32) -> (i32, i32) {
    %c0_i32 = arith.constant 0 : i32
    %c0_i32_0 = arith.constant 0 : i32
    %c0_i32_1 = arith.constant 0 : i32
    return %c0_i32, %c0_i32_0 : i32, i32
  }
  func.func @transform_7(%arg0: i32) -> (i32, i32) {
    %c0_i32 = arith.constant 0 : i32
    %c0_i32_0 = arith.constant 0 : i32
    return %c0_i32, %arg0 : i32, i32
  }
}

</mosaic_0001>

<bundles_post_ra>
// kernel: tpu_custom_call.1
= control target key start
LH: loop header
LB: loop body
LE: loop exit
PB: predicated region body
PF: predicated region fallthrough
CT: control target
= control target key end

     0   :  { %s591_s0 = inlined_call_operand.vmem [shape: f32[128,16], index: 0, kind: input, shape index: {}]   ;;  %s592_s1 = inlined_call_operand.vmem [shape: bf16[32,16], index: 1, kind: input, shape index: {}]   ;;  %s593_s2 = inlined_call_operand.vmem [shape: f32[32,1], index: 2, kind: input, shape index: {}]   ;;  %s594_s3 = inlined_call_operand.vmem [shape: bf16[32,32], index: 3, kind: input, shape index: {}]   ;;  %s595_s4 = inlined_call_operand.vmem [shape: f32[32,1], index: 4, kind: input, shape index: {}]   ;;  %s596_s5 = inlined_call_operand.vmem [shape: f32[32,1], index: 5, kind: input, shape index: {}]   ;;  %s597_s6 = inlined_call_operand.<no memory space> [shape: f32[1,1], index: 6, kind: input, shape index: {}]   ;;  %s598_s7 = inlined_call_operand.hbm [shape: f32[1,128], index: 7, kind: output, shape index: {}]  }
   0x1   :  { %v12_v0 = vstv %s597_s6 }
   0x2   :  { %13 = vst [vmem:[#allocation2] sm:$0x1] %v12_v0 }
   0x3   :  { %v44_v1 = vld [vmem:[%s591_s0 + $0x70] sm:$0xff]  ;;  %v45_v2 = vld [vmem:[%s591_s0 + $0x78] sm:$0xff]  ;;  %vm92_vm0 = vcmask 130048   ;;  %v42_v3 = vld [vmem:[%s591_s0 + $0x60] sm:$0xff]  ;;  %v427_v6 = vmov 0  }
   0x4   :  { %v53_v4 = vpack.c.bf16 %v45_v2, %v44_v1  ;;  %v43_v5 = vld [vmem:[%s591_s0 + $0x68] sm:$0xff]  ;;  %399 = vset.pattern.permute.xlu0 %v427_v6  ;;  %400 = vset.pattern.permute.xlu1 %v427_v6  ;;  %v40_v9 = vld [vmem:[%s591_s0 + $0x50] sm:$0xff]  ;;  %v41_v10 = vld [vmem:[%s591_s0 + $0x58] sm:$0xff] }
   0x5   :  { %v52_v7 = vpack.c.bf16 %v43_v5, %v42_v3  ;;  %v401_v11 = vld [vmem:[%s592_s1] sm:$0xff]   ;;  %v60_v12 = vld [vmem:[%s593_s2 + $0x10] sm:$0xff]  ;;  %v51_v15 = vpack.c.bf16 %v41_v10, %v40_v9  ;;  %v61_v16 = vld [vmem:[%s593_s2 + $0x18] sm:$0xff] }
   0x6   :  { %389 = vmatprep.subr.msk.bf16.mxu0 %vm92_vm0, %v53_v4  ;;  %v121_v8 = vsel %vm92_vm0, %v53_v4, 0  ;;  %377 = vmatprep.mubr.msk.bf16.mxu0 %vm92_vm0, %v401_v11  ;;  %v58_v13 = vld [vmem:[%s593_s2] sm:$0xff]  ;;  %v59_v17 = vld [vmem:[%s593_s2 + $0x8] sm:$0xff] }
   0x7   :  { %362 = vmatpush3.bf16.xpose.msra.mxu0 %v121_v8  ;;  %74 = vperm.xlu0 %399, %v60_v12   ;;  %v118_v14 = vsel %vm92_vm0, %v52_v7, 0  ;;  %v182_v18 = vld [vmem:[%s595_s4] sm:$0xff] }
   0x8   :  { %390 = vmatprep.subr.msk.bf16.mxu0 %vm92_vm0, %v52_v7  ;;  %64 = vperm.xlu1 %400, %v58_v13  }
   0xb   :  { %79 = vperm.xlu0 %399, %v61_v16  }
   0xc   :  { %69 = vperm.xlu1 %400, %v59_v17  }
   0xf   :  { %364 = vmatpush3.bf16.xpose.msra.mxu0 %v118_v14 }
  0x10   :  { %391 = vmatprep.subr.msk.bf16.mxu0 %vm92_vm0, %v51_v15 }
  0x11   :  { %14 = vsyncpa [#allocation4], 0  ;;  %v38_v19 = vld [vmem:[%s591_s0 + $0x40] sm:$0xff]  ;;  %v39_v20 = vld [vmem:[%s591_s0 + $0x48] sm:$0xff]  ;;  %188 = vperm.xlu0 %399, %v182_v18   ;;  %v115_v22 = vsel %vm92_vm0, %v51_v15, 0  ;;  %vm216_vm1 = vcmask 261120  }
  0x12   :  { %v183_v21 = vld [vmem:[%s595_s4 + $0x8] sm:$0xff]  ;;  %v50_v23 = vpack.c.bf16 %v39_v20, %v38_v19  ;;  %v184_v24 = vld [vmem:[%s595_s4 + $0x10] sm:$0xff]  ;;  %v185_v25 = vld [vmem:[%s595_s4 + $0x18] sm:$0xff] }
  0x13   :  { %193 = vperm.xlu1 %400, %v183_v21   ;;  %v276_v26 = vld [vmem:[%s596_s5] sm:$0xff]  ;;  %v36_v27 = vld [vmem:[%s591_s0 + $0x30] sm:$0xff]  ;;  %v37_v28 = vld [vmem:[%s591_s0 + $0x38] sm:$0xff] }
  0x14   :  { %v277_v29 = vld [vmem:[%s596_s5 + $0x8] sm:$0xff]  ;;  %v112_v30 = vsel %vm92_vm0, %v50_v23, 0  ;;  %v49_v31 = vpack.c.bf16 %v37_v28, %v36_v27  ;;  %v278_v32 = vld [vmem:[%s596_s5 + $0x10] sm:$0xff]  ;;  %v279_v33 = vld [vmem:[%s596_s5 + $0x18] sm:$0xff] }
  0x15   :  { %198 = vperm.xlu0 %399, %v184_v24   ;;  %v313_v34 = vld [vmem:[#allocation2] sm:$0x1]  ;;  %v35_v36 = vld [vmem:[%s591_s0 + $0x28] sm:$0xff]  ;;  %v32_v39 = vld [vmem:[%s591_s0 + $0x10] sm:$0xff] }
  0x16   :  { %v34_v35 = vld [vmem:[%s591_s0 + $0x20] sm:$0xff]  ;;  %v109_v37 = vsel %vm92_vm0, %v49_v31, 0  ;;  %v33_v40 = vld [vmem:[%s591_s0 + $0x18] sm:$0xff]  ;;  %v31_v44 = vld [vmem:[%s591_s0 + $0x8] sm:$0xff] }
  0x17   :  { %366 = vmatpush3.bf16.xpose.msra.mxu0 %v115_v22  ;;  %203 = vperm.xlu1 %400, %v185_v25   ;;  %v48_v38 = vpack.c.bf16 %v35_v36, %v34_v35  ;;  %v47_v42 = vpack.c.bf16 %v33_v40, %v32_v39  ;;  %v30_v43 = vld [vmem:[%s591_s0] sm:$0xff]  ;;  %v402_v48 = vld [vmem:[%s592_s1 + $0x8] sm:$0xff]  }
  0x18   :  { %392 = vmatprep.subr.msk.bf16.mxu0 %vm92_vm0, %v50_v23  ;;  %v46_v46 = vpack.c.bf16 %v31_v44, %v30_v43  ;;  %v403_v49 = vld [vmem:[%s594_s3] sm:$0xff]   ;;  %v404_v4 = vld [vmem:[%s594_s3 + $0x8] sm:$0xff]   ;;  %s428_s3 = smov [#allocation3]  }
  0x19   :  { %282 = vperm.xlu0 %399, %v276_v26   ;;  %v106_v41 = vsel %vm92_vm0, %v48_v38, 0  ;;  %v103_v45 = vsel %vm92_vm0, %v47_v42, 0  ;;  %385 = vmatprep.mubr.msk.bf16.mxu1 %vm216_vm1, %v403_v49  ;;  %s331_s12 = sshll.u32 %s428_s3, 4  ;;  %s332_s12 = int_to_ptr.vmem [resolvable:$true] %s331_s12 }
  0x1a   :  { %v100_v47 = vsel %vm92_vm0, %v46_v46, 0  ;;  %s405_s13 = scalar_lea.vmem %s332_s12, 16  ;;  %s409_s14 = scalar_lea.vmem %s332_s12, 32 }
  0x1b   :  { %287 = vperm.xlu1 %400, %v277_v29   ;;  %p406_p0 = scmp.ne.s32.totalorder %s332_s12, %s405_s13  ;;  %p410_p1 = scmp.lt.s32.totalorder %s332_s12, %s332_s12 }
  0x1c   :  { %p411_p2 = scmp.lt.s32.totalorder %s409_s14, %s405_s13 }
  0x1d   :  { %292 = vperm.xlu0 %399, %v278_v32  }
  0x1e   :  { %p412_p3 = por %p411_p2, %p410_p1 }
  0x1f   :  { %368 = vmatpush3.bf16.xpose.msra.mxu0 %v112_v30  ;;  %297 = vperm.xlu1 %400, %v279_v33  }
  0x20   :  { %393 = vmatprep.subr.msk.bf16.mxu0 %vm92_vm0, %v49_v31  ;;  %v319_v31 = vlaneseq  ;;  %p413_p4 = pnand %p412_p3, %p406_p0 }
  0x21   :  { %316 = vperm.xlu0 %399, %v313_v34  }
  0x22   :  { %v320_v34 = vshrl.u32 %v319_v31, 7 }
  0x27   :  { %370 = vmatpush3.bf16.xpose.msra.mxu0 %v109_v37  ;;  %v321_v37 = vsub.s32 0, %v320_v34 }
  0x28   :  { %394 = vmatprep.subr.msk.bf16.mxu0 %vm92_vm0, %v48_v38 }
  0x2f   :  { %372 = vmatpush3.bf16.xpose.msra.mxu0 %v106_v41 }
  0x30   :  { %395 = vmatprep.subr.msk.bf16.mxu0 %vm92_vm0, %v47_v42 }
  0x37   :  { %374 = vmatpush3.bf16.xpose.msra.mxu0 %v103_v45 }
  0x38   :  { %396 = vmatprep.subr.msk.bf16.mxu0 %vm92_vm0, %v46_v46 }
  0x3f   :  { %376 = vmatpush3.bf16.xpose.msra.mxu0 %v100_v47 }
  0x46   :  { %378 = vmatmul.mubr.msk.bf16.vlgmr.msra.gmra.mxu0 %vm92_vm0, %v402_v48 }
  0x82   :  { %v75_v50 = vpop.permute.xlu0 %74 }
  0x83   :  { %v65_v51 = vpop.permute.xlu1 %64 }
  0x86   :  { %v80_v55 = vpop.permute.xlu0 %79 }
  0x87   :  { %v70_v59 = vpop.permute.xlu1 %69 }
  0x8c   :  { %v189_v5 = vpop.permute.xlu0 %188 }
  0x8e   :  { %v194_v6 = vpop.permute.xlu1 %193 }
  0x90   :  { %v199_v7 = vpop.permute.xlu0 %198 }
  0x92   :  { %v204_v9 = vpop.permute.xlu1 %203 }
  0x94   :  { %v283_v14 = vpop.permute.xlu0 %282 }
  0x96   :  { %v288_v19 = vpop.permute.xlu1 %287 }
  0x98   :  { %v293_v25 = vpop.permute.xlu0 %292 }
  0x9a   :  { %v298_v28 = vpop.permute.xlu1 %297 }
  0x9c   :  { %v317_v39 = vpop.permute.xlu0 %316 }
  0x9d   :  { %v322_v41 = vrot.slane %v317_v39, %v321_v37 }
 0x106   :  { %v379_v52 = vpop.f32.mrf.mxu0 }
 0x107   :  { %v166_v54 = vadd.f32 %v379_v52, %v75_v50 }
 0x108   :  { %v157_v53 = vpop.f32.mrf.mxu0 }
 0x109   :  { %v158_v57 = vadd.f32 %v157_v53, %v65_v51  ;;  %v174_v61 = vmax.f32 %v166_v54, 0.0 }
 0x10a   :  { %v380_v56 = vpop.f32.mrf.mxu0 }
 0x10b   :  { %v169_v58 = vadd.f32 %v380_v56, %v80_v55  ;;  %v172_v0 = vmax.f32 %v158_v57, 0.0 }
 0x10c   :  { %v160_v60 = vpop.f32.mrf.mxu0 }
 0x10d   :  { %v175_v62 = vmax.f32 %v169_v58, 0.0  ;;  %v161_v63 = vadd.f32 %v160_v60, %v70_v59 }
 0x10f   :  { %v173_v1 = vmax.f32 %v161_v63, 0.0  ;;  %v181_v2 = vpack.c.bf16 %v175_v62, %v174_v61 }
 0x111   :  { %v180_v3 = vpack.c.bf16 %v173_v1, %v172_v0  ;;  %381 = vmatprep.subr.bf16.mxu1 %v181_v2 }
 0x112   :  { %382 = vmatpush3.bf16.msra.mxu1 %v181_v2 }
 0x113   :  { %383 = vmatprep.subr.bf16.mxu1 %v180_v3 }
 0x116   :  { %384 = vmatpush3.bf16.msra.mxu1 %v180_v3 }
 0x119   :  { %386 = vmatmul.mubr.msk.bf16.vlgmr.msra.gmra.mxu1 %vm216_vm1, %v404_v4 }
 0x1d9   :  { %v387_v8 = vpop.f32.mrf.mxu1 }
 0x1da   :  { %v266_v13 = vadd.f32 %v387_v8, %v199_v7 }
 0x1db   :  { %v257_v10 = vpop.f32.mrf.mxu1 }
 0x1dc   :  { %v258_v11 = vadd.f32 %v257_v10, %v189_v5  ;;  %v274_v20 = vmax.f32 %v266_v13, 0.0 }
 0x1dd   :  { %v388_v12 = vpop.f32.mrf.mxu1 }
 0x1de   :  { %v272_v16 = vmax.f32 %v258_v11, 0.0  ;;  %v269_v17 = vadd.f32 %v388_v12, %v204_v9  ;;  %v302_v26 = vmul.f32 %v293_v25, %v274_v20 }
 0x1df   :  { %v260_v15 = vpop.f32.mrf.mxu1 }
 0x1e0   :  { %v261_v18 = vadd.f32 %v260_v15, %v194_v6  ;;  %v300_v22 = vmul.f32 %v283_v14, %v272_v16  ;;  %v275_v23 = vmax.f32 %v269_v17, 0.0 }
 0x1e2   :  { %v273_v21 = vmax.f32 %v261_v18, 0.0  ;;  %v303_v29 = vmul.f32 %v298_v28, %v275_v23 }
 0x1e4   :  { %v301_v24 = vmul.f32 %v288_v19, %v273_v21 }
 0x1e6   :  { %v304_v27 = vadd.f32 %v301_v24, %v300_v22 }
 0x1e8   :  { %v305_v30 = vadd.f32 %v304_v27, %v302_v26 }
 0x1ea   :  { %v306_v32 = vadd.f32 %v305_v30, %v303_v29 }
 0x1ec   :  { %v307_v33 = vrot.slane %v306_v32, 4 }
 0x1ee   :  { %v308_v35 = vadd.f32 %v307_v33, %v306_v32 }
 0x1f0   :  { %v309_v36 = vrot.slane %v308_v35, 2 }
 0x1f2   :  { %v310_v38 = vadd.f32 %v309_v36, %v308_v35 }
 0x1f4   :  { %v311_v40 = vrot.slane %v310_v38, 1 }
 0x1f6   :  { %v312_v42 = vadd.f32 %v311_v40, %v310_v38 }
 0x1f8   :  { %v323_v43 = vadd.f32 %v322_v41, %v312_v42 }
 0x1fa   :  { %324 = vst [vmem:[#allocation3] sm:$0x1] %v323_v43 }
 0x1fb   :  { %416 = shalt.err (!%p413_p4)
}
 0x1fc   :  { %334 = dma.vmem_to_hbm [thread:$0]  %s332_s12, 16, %s598_s7, [#allocation4]  }
 0x1fd   :  { %425 = dma.done.wait [#allocation4], 16  }
 0x1fe   :  { %426 = vsyncadd [#allocation4], 4294967280 }
 0x1ff   :  { %338 = vsyncpa [#allocation4], 1 }

</bundles_post_ra>
